<compile_context>
chip_gen: v6e
topology: v6e:2x2x1
jax: 0.10.0
libtpu: 0.0.40
codegen_flags: <defaults>
</compile_context>

<pallas_src>
import jax
import jax.numpy as jnp
from jax.experimental import pallas as pl
from jax.experimental.pallas import tpu as pltpu


# ----------------------------- helpers --------------------------------------


def _round_up(v, m):
    return ((v + m - 1) // m) * m


def _cdiv(a, b):
    return (a + b - 1) // b


def _vmem_capacity_bytes():
    """Per-core VMEM capacity; conservative 64 MiB (v7x) if query fails."""
    try:
        info = pltpu.get_tpu_info()
        cap = getattr(info, "vmem_capacity_bytes", None)
        if cap:
            return int(cap)
    except Exception:
        pass
    return 64 << 20


# ----------------------------- kernels --------------------------------------


def _kernel_logits(x_ref, we_ref, be_ref, wp_ref, bp_ref, out_ref):
    """Fused: h = x @ We + be ; logits = h @ Wp + bp (weights pre-transposed)."""
    x = x_ref[...].astype(we_ref.dtype)              # cast to compute dtype in VMEM
    h = jnp.dot(x, we_ref[...],
                preferred_element_type=jnp.float32) + be_ref[...]
    logits = jnp.dot(h.astype(wp_ref.dtype), wp_ref[...],
                     preferred_element_type=jnp.float32) + bp_ref[...]
    out_ref[...] = logits.astype(out_ref.dtype)


def _kernel_logits_emb(x_ref, we_ref, be_ref, wp_ref, bp_ref,
                       emb_ref, out_ref):
    """Same as above but also writes the encoder embedding."""
    x = x_ref[...].astype(we_ref.dtype)
    h = jnp.dot(x, we_ref[...],
                preferred_element_type=jnp.float32) + be_ref[...]
    emb_ref[...] = h.astype(emb_ref.dtype)
    logits = jnp.dot(h.astype(wp_ref.dtype), wp_ref[...],
                     preferred_element_type=jnp.float32) + bp_ref[...]
    out_ref[...] = logits.astype(out_ref.dtype)


# ----------------------------- wrappers --------------------------------------


def prepare_linear_eval_params(w_enc, b_enc, w_probe, b_probe,
                               compute_dtype=jnp.bfloat16):
    """One-time prep (weights are frozen for linear eval): transpose to
    (in, out) layout, zero-pad output dims to lane multiples of 128, cast.

    w_enc:   (D_enc, F_in)   encoder nn.Linear weight
    b_enc:   (D_enc,)        encoder nn.Linear bias
    w_probe: (C, D_enc)      probe nn.Linear weight
    b_probe: (C,)            probe nn.Linear bias
    """
    D_enc, F_in = w_enc.shape
    C = w_probe.shape[0]
    D_pad = _round_up(D_enc, 128)
    C_pad = _round_up(C, 128)
    f32 = jnp.float32

    wt_enc = jnp.zeros((F_in, D_pad), compute_dtype).at[:, :D_enc].set(
        w_enc.T.astype(compute_dtype))
    be2 = jnp.zeros((1, D_pad), f32).at[:, :D_enc].set(b_enc.astype(f32))
    wt_probe = jnp.zeros((D_pad, C_pad), compute_dtype).at[:D_enc, :C].set(
        w_probe.T.astype(compute_dtype))
    bp2 = jnp.zeros((1, C_pad), f32).at[:, :C].set(b_probe.astype(f32))

    return dict(wt_enc=wt_enc, be=be2, wt_probe=wt_probe, bp=bp2,
                F_in=F_in, D_enc=D_enc, C=C, D_pad=D_pad, C_pad=C_pad,
                compute_dtype=jnp.dtype(compute_dtype))


def linear_eval_forward(x, params, get_embedding=False, *,
                        tm_max=1024, out_dtype=jnp.float32, emb_dtype=None,
                        single_buffer_weights=True):
    """JAX wrapper mirroring Linear_Eval.forward (inference).

    x:      (B, F_in) float32 (passed raw; cast to compute dtype in-kernel)
    params: output of prepare_linear_eval_params (computed once, reused)
    """
    B, F_in = x.shape
    assert F_in == params["F_in"], "x feature dim does not match encoder"
    D_enc, C = params["D_enc"], params["C"]
    D_pad, C_pad = params["D_pad"], params["C_pad"]
    cdt = params["compute_dtype"]
    ce = cdt.itemsize
    x_itemsize = jnp.dtype(x.dtype).itemsize
    if emb_dtype is None:
        emb_dtype = cdt
    emb_itemsize = jnp.dtype(emb_dtype).itemsize
    out_itemsize = jnp.dtype(out_dtype).itemsize

    vmem_cap = _vmem_capacity_bytes()

    # Resident (single-buffered) weight/bias footprint.
    resident_1x = (F_in * D_pad + D_pad * C_pad) * ce + (D_pad + C_pad) * 4
    if resident_1x > int(0.7 * vmem_cap):
        # TODO(synk): add a K/N-tiled fallback (extra 'arbitrary' grid axis +
        # f32 VMEM accumulator) for encoders too wide to keep VMEM-resident
        # (mainly a v7x 64 MiB concern).
        raise ValueError(
            f"Resident weights ({resident_1x} B) exceed the VMEM budget "
            f"({int(0.7 * vmem_cap)} B); K/N tiling fallback not implemented.")

    # Per-batch-row VMEM cost of one tile (double-buffered streamed operands,
    # single-counted in-kernel temporaries).
    per_row = (2 * F_in * x_itemsize                    # x tile (double-buffered)
               + (F_in * ce if ce != 4 else 0)          # in-kernel cast of x
               + D_pad * 4                              # h (f32)
               + (D_pad * ce if ce != 4 else 0)         # cast of h for probe matmul
               + C_pad * 4                              # logits f32 temp
               + 2 * C_pad * out_itemsize)              # logits out (double-buffered)
    if get_embedding:
        per_row += 2 * D_pad * emb_itemsize             # emb out (double-buffered)

    # Batch tile selection: fit within VMEM, keep >= 2 tiles when B allows so
    # v7x's two TensorCores both get work, and avoid gross batch padding.
    row_align = 8
    budget = int(0.75 * vmem_cap) - resident_1x
    tm_fit = max(row_align, (budget // max(per_row, 1)) // row_align * row_align)
    tm_cap = max(row_align, min(tm_max, tm_fit))
    n_tiles = max(1, _cdiv(B, tm_cap))
    if B >= 2 * row_align:
        n_tiles = max(n_tiles, 2)
    tm = min(tm_cap, _round_up(_cdiv(B, n_tiles), row_align))
    grid = (_cdiv(B, tm),)       # partial last tile; OOB rows masked on store

    batched = lambda i: (i, 0)   # x / outputs walk the batch dim
    resident = lambda i: (0, 0)  # weights / biases stay VMEM-resident

    def make_in_specs(single_buffer):
        if single_buffer:
            res = lambda shape: pl.BlockSpec(shape, resident,
                                             pipeline_mode=pl.Buffered(1))
        else:
            res = lambda shape: pl.BlockSpec(shape, resident)
        return [
            pl.BlockSpec((tm, F_in), batched),   # x tile
            res((F_in, D_pad)),                  # encoder weight (pre-T, padded)
            res((1, D_pad)),                     # encoder bias
            res((D_pad, C_pad)),                 # probe weight (pre-T, padded)
            res((1, C_pad)),                     # probe bias
        ]

    logits_spec = pl.BlockSpec((tm, C_pad), batched)
    emb_spec = pl.BlockSpec((tm, D_pad), batched)
    args = (x, params["wt_enc"], params["be"], params["wt_probe"], params["bp"])

    def run(single_buffer):
        resident_bytes = resident_1x * (1 if single_buffer else 2)
        vmem_bytes = resident_bytes + tm * per_row + (2 << 20)   # + margin
        vmem_limit = int(min(max(vmem_bytes, 4 << 20), int(0.9 * vmem_cap)))
        compiler_params = pltpu.CompilerParams(
            dimension_semantics=("parallel",),   # shards batch tiles on v7x's 2 TCs
            vmem_limit_bytes=vmem_limit,
        )
        if get_embedding:
            return pl.pallas_call(
                _kernel_logits_emb,
                grid=grid,
                in_specs=make_in_specs(single_buffer),
                out_specs=(emb_spec, logits_spec),
                out_shape=(
                    jax.ShapeDtypeStruct((B, D_pad), emb_dtype),
                    jax.ShapeDtypeStruct((B, C_pad), out_dtype),
                ),
                compiler_params=compiler_params,
            )(*args)
        return pl.pallas_call(
            _kernel_logits,
            grid=grid,
            in_specs=make_in_specs(single_buffer),
            out_specs=logits_spec,
            out_shape=jax.ShapeDtypeStruct((B, C_pad), out_dtype),
            compiler_params=compiler_params,
        )(*args)

    out = None
    if single_buffer_weights and hasattr(pl, "Buffered"):
        try:
            out = run(True)
        except Exception:
            out = None                 # fall back to double-buffered residents
    if out is None:
        out = run(False)

    if get_embedding:
        emb_p, logits_p = out
        return emb_p[:, :D_enc], logits_p[:, :C]
    return out[:, :C]


# ----------------------------- test harness ---------------------------------


def _init_linear_params(key, out_dim, in_dim):
    """Deterministic init mimicking nn.Linear's uniform(-1/sqrt(in), 1/sqrt(in))."""
    kw, kb = jax.random.split(key)
    bound = 1.0 / jnp.sqrt(jnp.float32(in_dim))
    w = jax.random.uniform(kw, (out_dim, in_dim), jnp.float32, -bound, bound)
    b = jax.random.uniform(kb, (out_dim,), jnp.float32, -bound, bound)
    return w, b


if __name__ == "__main__":
    # Small shapes consistent with the module:
    #   batch=8, raw input features=32, encoder output dim (input_dim)=64,
    #   num_categories=2, predictor_layer=0 (single Linear probe, the default).
    B, F_IN, D_ENC, NUM_CATEGORIES = 8, 32, 64, 2

    root = jax.random.PRNGKey(0)
    k_x, k_enc, k_probe = jax.random.split(root, 3)

    x = jax.random.normal(k_x, (B, F_IN), jnp.float32)
    w_enc, b_enc = _init_linear_params(k_enc, D_ENC, F_IN)
    w_probe, b_probe = _init_linear_params(k_probe, NUM_CATEGORIES, D_ENC)

    # Plain-JAX reference (same math as the PyTorch Linear chain).
    h_ref = x @ w_enc.T + b_enc
    ref = h_ref.reshape(B, -1) @ w_probe.T + b_probe

    # --- f32 compute path (exact check) ---
    params_f32 = prepare_linear_eval_params(w_enc, b_enc, w_probe, b_probe,
                                            compute_dtype=jnp.float32)
    logits_f32 = jax.block_until_ready(linear_eval_forward(x, params_f32))
    assert logits_f32.shape == (B, NUM_CATEGORIES)
    assert jnp.allclose(logits_f32, ref, atol=1e-5, rtol=1e-5)

    # --- default bf16 compute path (params prepared once, reused per call) ---
    params = prepare_linear_eval_params(w_enc, b_enc, w_probe, b_probe)
    logits = jax.block_until_ready(linear_eval_forward(x, params))
    assert logits.shape == (B, NUM_CATEGORIES)
    assert jnp.allclose(logits, ref, atol=5e-2, rtol=5e-2)

    # --- get_embedding=True path (embedding emitted in bf16) ---
    emb, logits2 = linear_eval_forward(x, params, get_embedding=True)
    emb, logits2 = jax.block_until_ready((emb, logits2))
    assert emb.shape == (B, D_ENC)
    assert jnp.allclose(emb.astype(jnp.float32), h_ref, atol=5e-2, rtol=5e-2)
    assert jnp.allclose(logits2, ref, atol=5e-2, rtol=5e-2)

    print("KERNEL_OK")
</pallas_src>

<mosaic_0001>
module attributes {stable_mosaic.version = 11 : i64} {
  func.func @_kernel_logits(%arg0: i32, %arg1: memref<8x32xf32, #tpu.memory_space<vmem>>, %arg2: memref<32x128xf32, #tpu.memory_space<vmem>>, %arg3: memref<1x128xf32, #tpu.memory_space<vmem>>, %arg4: memref<128x128xf32, #tpu.memory_space<vmem>>, %arg5: memref<1x128xf32, #tpu.memory_space<vmem>>, %arg6: memref<8x128xf32, #tpu.memory_space<vmem>>) attributes {dimension_semantics = [#tpu.dimension_semantics<parallel>], iteration_bounds = array<i64: 1>, scalar_prefetch = 0 : i64, scratch_operands = 0 : i64, tpu.core_type = #tpu.core_type<tc>, window_params = [{transform_indices = @transform_0, window_bounds = array<i64: 8, 32>}, {pipeline_mode = #tpu.pipeline_mode<synchronous>, transform_indices = @transform_1, window_bounds = array<i64: 32, 128>}, {pipeline_mode = #tpu.pipeline_mode<synchronous>, transform_indices = @transform_2, window_bounds = array<i64: 1, 128>}, {pipeline_mode = #tpu.pipeline_mode<synchronous>, transform_indices = @transform_3, window_bounds = array<i64: 128, 128>}, {pipeline_mode = #tpu.pipeline_mode<synchronous>, transform_indices = @transform_4, window_bounds = array<i64: 1, 128>}, {transform_indices = @transform_5, window_bounds = array<i64: 8, 128>}]} {
    %c0 = arith.constant 0 : index
    %c0_0 = arith.constant 0 : index
    %0 = vector.load %arg1[%c0, %c0_0] : memref<8x32xf32, #tpu.memory_space<vmem>>, vector<8x32xf32>
    %c0_1 = arith.constant 0 : index
    %c0_2 = arith.constant 0 : index
    %1 = vector.load %arg2[%c0_1, %c0_2] : memref<32x128xf32, #tpu.memory_space<vmem>>, vector<32x128xf32>
    %cst = arith.constant dense<0.000000e+00> : vector<8x128xf32>
    %2 = tpu.matmul %0, %1, %cst {dimension_numbers = #tpu.dot_dimension_numbers<[1], [0], [0], [1], [0, 0, 1, 1], [], []>} : vector<8x32xf32>, vector<32x128xf32>, vector<8x128xf32> -> vector<8x128xf32>
    %c0_3 = arith.constant 0 : index
    %c0_4 = arith.constant 0 : index
    %3 = vector.load %arg3[%c0_3, %c0_4] : memref<1x128xf32, #tpu.memory_space<vmem>>, vector<1x128xf32>
    %4 = vector.broadcast %3 : vector<1x128xf32> to vector<8x128xf32>
    %5 = arith.addf %2, %4 : vector<8x128xf32>
    %c0_5 = arith.constant 0 : index
    %c0_6 = arith.constant 0 : index
    %6 = vector.load %arg4[%c0_5, %c0_6] : memref<128x128xf32, #tpu.memory_space<vmem>>, vector<128x128xf32>
    %cst_7 = arith.constant dense<0.000000e+00> : vector<8x128xf32>
    %7 = tpu.matmul %5, %6, %cst_7 {dimension_numbers = #tpu.dot_dimension_numbers<[1], [0], [0], [1], [0, 0, 1, 1], [], []>} : vector<8x128xf32>, vector<128x128xf32>, vector<8x128xf32> -> vector<8x128xf32>
    %c0_8 = arith.constant 0 : index
    %c0_9 = arith.constant 0 : index
    %8 = vector.load %arg5[%c0_8, %c0_9] : memref<1x128xf32, #tpu.memory_space<vmem>>, vector<1x128xf32>
    %9 = vector.broadcast %8 : vector<1x128xf32> to vector<8x128xf32>
    %10 = arith.addf %7, %9 : vector<8x128xf32>
    %c0_10 = arith.constant 0 : index
    %c0_11 = arith.constant 0 : index
    %11 = vector.load %arg6[%c0_10, %c0_11] : memref<8x128xf32, #tpu.memory_space<vmem>>, vector<8x128xf32>
    tpu.vector_store %arg6[%c0_10, %c0_11], %10 {strides = array<i32>} : memref<8x128xf32, #tpu.memory_space<vmem>>, vector<8x128xf32>,
    return
  }
  func.func @transform_0(%arg0: i32) -> (i32, i32) {
    %c0_i32 = arith.constant 0 : i32
    %c0_i32_0 = arith.constant 0 : i32
    return %arg0, %c0_i32 : i32, i32
  }
  func.func @transform_1(%arg0: i32) -> (i32, i32) {
    %c0_i32 = arith.constant 0 : i32
    %c0_i32_0 = arith.constant 0 : i32
    %c0_i32_1 = arith.constant 0 : i32
    return %c0_i32, %c0_i32_0 : i32, i32
  }
  func.func @transform_2(%arg0: i32) -> (i32, i32) {
    %c0_i32 = arith.constant 0 : i32
    %c0_i32_0 = arith.constant 0 : i32
    %c0_i32_1 = arith.constant 0 : i32
    return %c0_i32, %c0_i32_0 : i32, i32
  }
  func.func @transform_3(%arg0: i32) -> (i32, i32) {
    %c0_i32 = arith.constant 0 : i32
    %c0_i32_0 = arith.constant 0 : i32
    %c0_i32_1 = arith.constant 0 : i32
    return %c0_i32, %c0_i32_0 : i32, i32
  }
  func.func @transform_4(%arg0: i32) -> (i32, i32) {
    %c0_i32 = arith.constant 0 : i32
    %c0_i32_0 = arith.constant 0 : i32
    %c0_i32_1 = arith.constant 0 : i32
    return %c0_i32, %c0_i32_0 : i32, i32
  }
  func.func @transform_5(%arg0: i32) -> (i32, i32) {
    %c0_i32 = arith.constant 0 : i32
    %c0_i32_0 = arith.constant 0 : i32
    return %arg0, %c0_i32 : i32, i32
  }
}

module attributes {stable_mosaic.version = 11 : i64} {
  func.func @_kernel_logits(%arg0: i32, %arg1: memref<8x32xf32, #tpu.memory_space<vmem>>, %arg2: memref<32x128xf32, #tpu.memory_space<vmem>>, %arg3: memref<1x128xf32, #tpu.memory_space<vmem>>, %arg4: memref<128x128xf32, #tpu.memory_space<vmem>>, %arg5: memref<1x128xf32, #tpu.memory_space<vmem>>, %arg6: memref<8x128xf32, #tpu.memory_space<vmem>>) attributes {dimension_semantics = [#tpu.dimension_semantics<parallel>], iteration_bounds = array<i64: 1>, scalar_prefetch = 0 : i64, scratch_operands = 0 : i64, tpu.core_type = #tpu.core_type<tc>, window_params = [{transform_indices = @transform_0, window_bounds = array<i64: 8, 32>}, {pipeline_mode = #tpu.pipeline_mode<synchronous>, transform_indices = @transform_1, window_bounds = array<i64: 32, 128>}, {pipeline_mode = #tpu.pipeline_mode<synchronous>, transform_indices = @transform_2, window_bounds = array<i64: 1, 128>}, {pipeline_mode = #tpu.pipeline_mode<synchronous>, transform_indices = @transform_3, window_bounds = array<i64: 128, 128>}, {pipeline_mode = #tpu.pipeline_mode<synchronous>, transform_indices = @transform_4, window_bounds = array<i64: 1, 128>}, {transform_indices = @transform_5, window_bounds = array<i64: 8, 128>}]} {
    %c0 = arith.constant 0 : index
    %c0_0 = arith.constant 0 : index
    %0 = vector.load %arg1[%c0, %c0_0] : memref<8x32xf32, #tpu.memory_space<vmem>>, vector<8x32xf32>
    %c0_1 = arith.constant 0 : index
    %c0_2 = arith.constant 0 : index
    %1 = vector.load %arg2[%c0_1, %c0_2] : memref<32x128xf32, #tpu.memory_space<vmem>>, vector<32x128xf32>
    %cst = arith.constant dense<0.000000e+00> : vector<8x128xf32>
    %2 = tpu.matmul %0, %1, %cst {dimension_numbers = #tpu.dot_dimension_numbers<[1], [0], [0], [1], [0, 0, 1, 1], [], []>} : vector<8x32xf32>, vector<32x128xf32>, vector<8x128xf32> -> vector<8x128xf32>
    %c0_3 = arith.constant 0 : index
    %c0_4 = arith.constant 0 : index
    %3 = vector.load %arg3[%c0_3, %c0_4] : memref<1x128xf32, #tpu.memory_space<vmem>>, vector<1x128xf32>
    %4 = vector.broadcast %3 : vector<1x128xf32> to vector<8x128xf32>
    %5 = arith.addf %2, %4 : vector<8x128xf32>
    %c0_5 = arith.constant 0 : index
    %c0_6 = arith.constant 0 : index
    %6 = vector.load %arg4[%c0_5, %c0_6] : memref<128x128xf32, #tpu.memory_space<vmem>>, vector<128x128xf32>
    %cst_7 = arith.constant dense<0.000000e+00> : vector<8x128xf32>
    %7 = tpu.matmul %5, %6, %cst_7 {dimension_numbers = #tpu.dot_dimension_numbers<[1], [0], [0], [1], [0, 0, 1, 1], [], []>} : vector<8x128xf32>, vector<128x128xf32>, vector<8x128xf32> -> vector<8x128xf32>
    %c0_8 = arith.constant 0 : index
    %c0_9 = arith.constant 0 : index
    %8 = vector.load %arg5[%c0_8, %c0_9] : memref<1x128xf32, #tpu.memory_space<vmem>>, vector<1x128xf32>
    %9 = vector.broadcast %8 : vector<1x128xf32> to vector<8x128xf32>
    %10 = arith.addf %7, %9 : vector<8x128xf32>
    %c0_10 = arith.constant 0 : index
    %c0_11 = arith.constant 0 : index
    %11 = vector.load %arg6[%c0_10, %c0_11] : memref<8x128xf32, #tpu.memory_space<vmem>>, vector<8x128xf32>
    tpu.vector_store %arg6[%c0_10, %c0_11], %10 {strides = array<i32>} : memref<8x128xf32, #tpu.memory_space<vmem>>, vector<8x128xf32>,
    return
  }
  func.func @transform_0(%arg0: i32) -> (i32, i32) {
    %c0_i32 = arith.constant 0 : i32
    %c0_i32_0 = arith.constant 0 : i32
    return %arg0, %c0_i32 : i32, i32
  }
  func.func @transform_1(%arg0: i32) -> (i32, i32) {
    %c0_i32 = arith.constant 0 : i32
    %c0_i32_0 = arith.constant 0 : i32
    %c0_i32_1 = arith.constant 0 : i32
    return %c0_i32, %c0_i32_0 : i32, i32
  }
  func.func @transform_2(%arg0: i32) -> (i32, i32) {
    %c0_i32 = arith.constant 0 : i32
    %c0_i32_0 = arith.constant 0 : i32
    %c0_i32_1 = arith.constant 0 : i32
    return %c0_i32, %c0_i32_0 : i32, i32
  }
  func.func @transform_3(%arg0: i32) -> (i32, i32) {
    %c0_i32 = arith.constant 0 : i32
    %c0_i32_0 = arith.constant 0 : i32
    %c0_i32_1 = arith.constant 0 : i32
    return %c0_i32, %c0_i32_0 : i32, i32
  }
  func.func @transform_4(%arg0: i32) -> (i32, i32) {
    %c0_i32 = arith.constant 0 : i32
    %c0_i32_0 = arith.constant 0 : i32
    %c0_i32_1 = arith.constant 0 : i32
    return %c0_i32, %c0_i32_0 : i32, i32
  }
  func.func @transform_5(%arg0: i32) -> (i32, i32) {
    %c0_i32 = arith.constant 0 : i32
    %c0_i32_0 = arith.constant 0 : i32
    return %arg0, %c0_i32 : i32, i32
  }
}

</mosaic_0001>

<bundles_post_ra>
// kernel: tpu_custom_call.1
= control target key start
LH: loop header
LB: loop body
LE: loop exit
PB: predicated region body
PF: predicated region fallthrough
CT: control target
= control target key end

     0   :  { %10 = vsyncpa [#allocation3], 0  ;;  %s499_s0 = inlined_call_operand.hbm [shape: f32[8,32], index: 0, kind: input, shape index: {}]   ;;  %s500_s1 = inlined_call_operand.hbm [shape: f32[32,128], index: 1, kind: input, shape index: {}]   ;;  %s501_s2 = inlined_call_operand.vmem [shape: f32[1,128], index: 2, kind: input, shape index: {}]   ;;  %s502_s3 = inlined_call_operand.hbm [shape: f32[128,128], index: 3, kind: input, shape index: {}]   ;;  %s503_s4 = inlined_call_operand.vmem [shape: f32[1,128], index: 4, kind: input, shape index: {}]   ;;  %s504_s5 = inlined_call_operand.hbm [shape: f32[8,128], index: 5, kind: output, shape index: {}]  }
   0x1   :  { %11 = vsyncpa [#allocation6], 0 }
   0x2   :  { %12 = vsyncpa [#allocation4], 0  ;;  %s421_s18 = smov [#allocation5]  }
   0x3   :  { %s28_s19 = sshll.u32 %s421_s18, 4  ;;  %s29_s19 = int_to_ptr.vmem [resolvable:$true] %s28_s19 }
   0x4   :  { %s343_s20 = scalar_lea.vmem %s29_s19, 512  ;;  %p348_p1 = scmp.lt.s32.totalorder %s29_s19, %s29_s19 }
   0x5   :  { %p344_p0 = scmp.ne.s32.totalorder %s29_s19, %s343_s20  ;;  %p349_p2 = scmp.lt.s32.totalorder %s343_s20, %s343_s20 }
   0x7   :  { %p350_p3 = por %p349_p2, %p348_p1 }
   0x9   :  { %p351_p4 = pnand %p350_p3, %p344_p0 }
   0xb   :  { %354 = shalt.err (!%p351_p4)
}
   0xc   :  { %s422_s21 = smov 128   ;;  %s423_s22 = smov 8  }
   0xd   :  { %34 = dma.hbm_to_vmem [thread:$0]  %s500_s1, 512, %s29_s19, [#allocation6], %s422_s21, %s422_s21, %s423_s22  }
   0xe   :  { %s424_s25 = smov [#allocation2]   ;;  %s425_s27 = smov [#allocation7]  }
   0xf   :  { %s19_s26 = sshll.u32 %s424_s25, 4  ;;  %s42_s28 = sshll.u32 %s425_s27, 4  ;;  %s20_s26 = int_to_ptr.vmem [resolvable:$true] %s19_s26  ;;  %s43_s28 = int_to_ptr.vmem [resolvable:$true] %s42_s28 }
  0x10   :  { %s363_s29 = scalar_lea.vmem %s20_s26, 128  ;;  %p368_p6 = scmp.lt.s32.totalorder %s20_s26, %s20_s26 }
  0x11   :  { %p364_p5 = scmp.ne.s32.totalorder %s20_s26, %s363_s29  ;;  %p369_p7 = scmp.lt.s32.totalorder %s363_s29, %s363_s29 }
  0x13   :  { %p370_p8 = por %p369_p7, %p368_p6 }
  0x15   :  { %p371_p9 = pnand %p370_p8, %p364_p5 }
  0x17   :  { %374 = shalt.err (!%p371_p9)
}
  0x18   :  { %22 = dma.hbm_to_vmem [thread:$0]  %s499_s0, 128, %s20_s26, [#allocation3]  }
  0x19   :  { %s383_s7 = scalar_lea.vmem %s43_s28, 2048  ;;  %p388_p11 = scmp.lt.s32.totalorder %s43_s28, %s43_s28 }
  0x1a   :  { %p384_p10 = scmp.ne.s32.totalorder %s43_s28, %s383_s7  ;;  %p389_p12 = scmp.lt.s32.totalorder %s383_s7, %s383_s7 }
  0x1c   :  { %p390_p13 = por %p389_p12, %p388_p11 }
  0x1e   :  { %p391_p0 = pnand %p390_p13, %p384_p10 }
  0x20   :  { %394 = shalt.err (!%p391_p0)
}
  0x21   :  { %48 = dma.hbm_to_vmem [thread:$0]  %s502_s3, 2048, %s43_s28, [#allocation6], %s422_s21, %s422_s21, %s423_s22  }
  0x22   :  { %415 = dma.done.wait [#allocation3], 128  }
  0x23   :  { %416 = vsyncadd [#allocation3], 4294967168 }
  0x24   :  { %417 = dma.done.wait [#allocation6], 2560  }
  0x25   :  { %418 = vsyncadd [#allocation6], 4294964736  ;;  %v426_v0 = vmov 0.0   ;;  %vm427_vm0 = vmmov 0   ;;  %v64_v1 = vld [vmem:[#allocation5 + $0x18] sm:$0xff]  ;;  %v63_v2 = vld [vmem:[#allocation5 + $0x10] sm:$0xff] }
  0x26   :  { %281 = vmatprep.subr.mxu0 %v426_v0  ;;  %289 = vmatprep.mubr.msk.f32.mxu0 %vm427_vm0, %v426_v0  ;;  %v161_v3 = vld [vmem:[#allocation7 + $0x78] sm:$0xff]  ;;  %v62_v4 = vld [vmem:[#allocation5 + $0x8] sm:$0xff]  ;;  %v160_v5 = vld [vmem:[#allocation7 + $0x70] sm:$0xff]  ;;  %vm72_vm1 = vcmask 261120   ;;  %s428_s11 = smov [#allocation8]  }
  0x27   :  { %292 = vmatprep.subr.mxu1 %v426_v0  ;;  %324 = vmatprep.mubr.msk.f32.mxu1 %vm427_vm0, %v426_v0  ;;  %v159_v6 = vld [vmem:[#allocation7 + $0x68] sm:$0xff]  ;;  %v61_v7 = vld [vmem:[#allocation5] sm:$0xff]  ;;  %v60_v8 = vld [vmem:[#allocation2] sm:$0xff]  ;;  %s246_s12 = sshll.u32 %s428_s11, 4  ;;  %s247_s12 = int_to_ptr.vmem [resolvable:$true] %s246_s12 }
  0x28   :  { %282 = vmatpush3.msra.mxu0 %v64_v1  ;;  %293 = vmatpush3.msra.mxu1 %v161_v3  ;;  %v158_v9 = vld [vmem:[#allocation7 + $0x60] sm:$0xff]  ;;  %v157_v10 = vld [vmem:[#allocation7 + $0x58] sm:$0xff]  ;;  %v156_v11 = vld [vmem:[#allocation7 + $0x50] sm:$0xff]  ;;  %s395_s13 = scalar_lea.vmem %s247_s12, 128  ;;  %p400_p2 = scmp.lt.s32.totalorder %s247_s12, %s247_s12 }
  0x29   :  { %283 = vmatprep.subr.mxu0 %v426_v0  ;;  %294 = vmatprep.subr.mxu1 %v426_v0  ;;  %v155_v12 = vld [vmem:[#allocation7 + $0x48] sm:$0xff]  ;;  %v154_v13 = vld [vmem:[#allocation7 + $0x40] sm:$0xff]  ;;  %v153_v14 = vld [vmem:[#allocation7 + $0x38] sm:$0xff]  ;;  %p396_p1 = scmp.ne.s32.totalorder %s247_s12, %s395_s13  ;;  %p401_p3 = scmp.lt.s32.totalorder %s395_s13, %s395_s13 }
  0x2a   :  { %284 = vmatpush3.msra.mxu0 %v63_v2  ;;  %295 = vmatpush3.msra.mxu1 %v160_v5  ;;  %v152_v15 = vld [vmem:[#allocation7 + $0x30] sm:$0xff]  ;;  %v151_v16 = vld [vmem:[#allocation7 + $0x28] sm:$0xff]  ;;  %v150_v17 = vld [vmem:[#allocation7 + $0x20] sm:$0xff] }
  0x2b   :  { %285 = vmatprep.subr.mxu0 %v426_v0  ;;  %296 = vmatprep.subr.mxu1 %v426_v0  ;;  %v149_v18 = vld [vmem:[#allocation7 + $0x18] sm:$0xff]  ;;  %v148_v19 = vld [vmem:[#allocation7 + $0x10] sm:$0xff]  ;;  %v147_v20 = vld [vmem:[#allocation7 + $0x8] sm:$0xff]  ;;  %p402_p4 = por %p401_p3, %p400_p2 }
  0x2c   :  { %286 = vmatpush3.msra.mxu0 %v62_v4  ;;  %297 = vmatpush3.msra.mxu1 %v159_v6  ;;  %v146_v21 = vld [vmem:[#allocation7] sm:$0xff]  ;;  %v256_v22 = vld [vmem:[%s501_s2] ss:$0 sm:$0xff] }
  0x2d   :  { %287 = vmatprep.subr.mxu0 %v426_v0  ;;  %298 = vmatprep.subr.mxu1 %v426_v0  ;;  %v258_v26 = vld [vmem:[%s503_s4] ss:$0 sm:$0xff]  ;;  %p403_p5 = pnand %p402_p4, %p396_p1 }
  0x2e   :  { %288 = vmatpush3.msra.mxu0 %v61_v7  ;;  %299 = vmatpush3.msra.mxu1 %v158_v9 }
  0x2f   :  { %290 = vmatmul.mubr.msk.f32.vlgmr.msra.gmra.mxu0 %vm72_vm1, %v60_v8  ;;  %300 = vmatprep.subr.mxu1 %v426_v0 }
  0x30   :  { %301 = vmatpush3.msra.mxu1 %v157_v10 }
  0x31   :  { %302 = vmatprep.subr.mxu1 %v426_v0 }
  0x32   :  { %303 = vmatpush3.msra.mxu1 %v156_v11 }
  0x33   :  { %304 = vmatprep.subr.mxu1 %v426_v0 }
  0x34   :  { %305 = vmatpush3.msra.mxu1 %v155_v12 }
  0x35   :  { %306 = vmatprep.subr.mxu1 %v426_v0 }
  0x36   :  { %307 = vmatpush3.msra.mxu1 %v154_v13 }
  0x37   :  { %308 = vmatprep.subr.mxu1 %v426_v0 }
  0x38   :  { %309 = vmatpush3.msra.mxu1 %v153_v14 }
  0x39   :  { %310 = vmatprep.subr.mxu1 %v426_v0 }
  0x3a   :  { %311 = vmatpush3.msra.mxu1 %v152_v15 }
  0x3b   :  { %312 = vmatprep.subr.mxu1 %v426_v0 }
  0x3c   :  { %313 = vmatpush3.msra.mxu1 %v151_v16 }
  0x3d   :  { %314 = vmatprep.subr.mxu1 %v426_v0 }
  0x3e   :  { %315 = vmatpush3.msra.mxu1 %v150_v17 }
  0x3f   :  { %316 = vmatprep.subr.mxu1 %v426_v0 }
  0x40   :  { %317 = vmatpush3.msra.mxu1 %v149_v18 }
  0x41   :  { %318 = vmatprep.subr.mxu1 %v426_v0 }
  0x42   :  { %319 = vmatpush3.msra.mxu1 %v148_v19 }
  0x43   :  { %320 = vmatprep.subr.mxu1 %v426_v0 }
  0x44   :  { %321 = vmatpush3.msra.mxu1 %v147_v20 }
  0x45   :  { %322 = vmatprep.subr.mxu1 %v426_v0 }
  0x46   :  { %323 = vmatpush3.msra.mxu1 %v146_v21 }
  0xef   :  { %v142_v23 = vpop.f32.mrf.mxu0 }
  0xf0   :  { %v143_v24 = vadd.f32 %v256_v22, %v142_v23 }
  0xf1   :  { %v291_v25 = vpop.f32.mrf.mxu0 }
  0xf2   :  { %325 = vmatmul.mubr.f32.vlgmr.msra.gmra.mxu1 %v143_v24 }
 0x1b2   :  { %v235_v27 = vpop.f32.mrf.mxu1 }
 0x1b3   :  { %v236_v28 = vadd.f32 %v258_v26, %v235_v27 }
 0x1b4   :  { %v326_v29 = vpop.f32.mrf.mxu1 }
 0x1b5   :  { %239 = vst [vmem:[#allocation8] sm:$0xff] %v236_v28 }
 0x1b6   :  { %406 = shalt.err (!%p403_p5)
}
 0x1b7   :  { %249 = dma.vmem_to_hbm [thread:$0]  %s247_s12, 128, %s504_s5, [#allocation4]  }
 0x1b8   :  { %419 = dma.done.wait [#allocation4], 128  }
 0x1b9   :  { %420 = vsyncadd [#allocation4], 4294967168 }
 0x1ba   :  { %253 = vsyncpa [#allocation3], 1 }
 0x1bb   :  { %254 = vsyncpa [#allocation6], 1 }
 0x1bc   :  { %255 = vsyncpa [#allocation4], 1 }

// kernel: tpu_custom_call.1
= control target key start
LH: loop header
LB: loop body
LE: loop exit
PB: predicated region body
PF: predicated region fallthrough
CT: control target
= control target key end

     0   :  { %10 = vsyncpa [#allocation3], 0  ;;  %s499_s0 = inlined_call_operand.hbm [shape: f32[8,32], index: 0, kind: input, shape index: {}]   ;;  %s500_s1 = inlined_call_operand.hbm [shape: f32[32,128], index: 1, kind: input, shape index: {}]   ;;  %s501_s2 = inlined_call_operand.vmem [shape: f32[1,128], index: 2, kind: input, shape index: {}]   ;;  %s502_s3 = inlined_call_operand.hbm [shape: f32[128,128], index: 3, kind: input, shape index: {}]   ;;  %s503_s4 = inlined_call_operand.vmem [shape: f32[1,128], index: 4, kind: input, shape index: {}]   ;;  %s504_s5 = inlined_call_operand.hbm [shape: f32[8,128], index: 5, kind: output, shape index: {}]  }
   0x1   :  { %11 = vsyncpa [#allocation6], 0 }
   0x2   :  { %12 = vsyncpa [#allocation4], 0  ;;  %s421_s18 = smov [#allocation5]  }
   0x3   :  { %s28_s19 = sshll.u32 %s421_s18, 4  ;;  %s29_s19 = int_to_ptr.vmem [resolvable:$true] %s28_s19 }
   0x4   :  { %s343_s20 = scalar_lea.vmem %s29_s19, 512  ;;  %p348_p1 = scmp.lt.s32.totalorder %s29_s19, %s29_s19 }
   0x5   :  { %p344_p0 = scmp.ne.s32.totalorder %s29_s19, %s343_s20  ;;  %p349_p2 = scmp.lt.s32.totalorder %s343_s20, %s343_s20 }
   0x7   :  { %p350_p3 = por %p349_p2, %p348_p1 }
   0x9   :  { %p351_p4 = pnand %p350_p3, %p344_p0 }
   0xb   :  { %354 = shalt.err (!%p351_p4)
}
   0xc   :  { %s422_s21 = smov 128   ;;  %s423_s22 = smov 8  }
   0xd   :  { %34 = dma.hbm_to_vmem [thread:$0]  %s500_s1, 512, %s29_s19, [#allocation6], %s422_s21, %s422_s21, %s423_s22  }
   0xe   :  { %s424_s25 = smov [#allocation2]   ;;  %s425_s27 = smov [#allocation7]  }
   0xf   :  { %s19_s26 = sshll.u32 %s424_s25, 4  ;;  %s42_s28 = sshll.u32 %s425_s27, 4  ;;  %s20_s26 = int_to_ptr.vmem [resolvable:$true] %s19_s26  ;;  %s43_s28 = int_to_ptr.vmem [resolvable:$true] %s42_s28 }
  0x10   :  { %s363_s29 = scalar_lea.vmem %s20_s26, 128  ;;  %p368_p6 = scmp.lt.s32.totalorder %s20_s26, %s20_s26 }
  0x11   :  { %p364_p5 = scmp.ne.s32.totalorder %s20_s26, %s363_s29  ;;  %p369_p7 = scmp.lt.s32.totalorder %s363_s29, %s363_s29 }
  0x13   :  { %p370_p8 = por %p369_p7, %p368_p6 }
  0x15   :  { %p371_p9 = pnand %p370_p8, %p364_p5 }
  0x17   :  { %374 = shalt.err (!%p371_p9)
}
  0x18   :  { %22 = dma.hbm_to_vmem [thread:$0]  %s499_s0, 128, %s20_s26, [#allocation3]  }
  0x19   :  { %s383_s7 = scalar_lea.vmem %s43_s28, 2048  ;;  %p388_p11 = scmp.lt.s32.totalorder %s43_s28, %s43_s28 }
  0x1a   :  { %p384_p10 = scmp.ne.s32.totalorder %s43_s28, %s383_s7  ;;  %p389_p12 = scmp.lt.s32.totalorder %s383_s7, %s383_s7 }
  0x1c   :  { %p390_p13 = por %p389_p12, %p388_p11 }
  0x1e   :  { %p391_p0 = pnand %p390_p13, %p384_p10 }
  0x20   :  { %394 = shalt.err (!%p391_p0)
}
  0x21   :  { %48 = dma.hbm_to_vmem [thread:$0]  %s502_s3, 2048, %s43_s28, [#allocation6], %s422_s21, %s422_s21, %s423_s22  }
  0x22   :  { %415 = dma.done.wait [#allocation3], 128  }
  0x23   :  { %416 = vsyncadd [#allocation3], 4294967168 }
  0x24   :  { %417 = dma.done.wait [#allocation6], 2560  }
  0x25   :  { %418 = vsyncadd [#allocation6], 4294964736  ;;  %v426_v0 = vmov 0.0   ;;  %vm427_vm0 = vmmov 0   ;;  %v64_v1 = vld [vmem:[#allocation5 + $0x18] sm:$0xff]  ;;  %v63_v2 = vld [vmem:[#allocation5 + $0x10] sm:$0xff] }
  0x26   :  { %281 = vmatprep.subr.mxu0 %v426_v0  ;;  %289 = vmatprep.mubr.msk.f32.mxu0 %vm427_vm0, %v426_v0  ;;  %v161_v3 = vld [vmem:[#allocation7 + $0x78] sm:$0xff]  ;;  %v62_v4 = vld [vmem:[#allocation5 + $0x8] sm:$0xff]  ;;  %v160_v5 = vld [vmem:[#allocation7 + $0x70] sm:$0xff]  ;;  %vm72_vm1 = vcmask 261120   ;;  %s428_s11 = smov [#allocation8]  }
  0x27   :  { %292 = vmatprep.subr.mxu1 %v426_v0  ;;  %324 = vmatprep.mubr.msk.f32.mxu1 %vm427_vm0, %v426_v0  ;;  %v159_v6 = vld [vmem:[#allocation7 + $0x68] sm:$0xff]  ;;  %v61_v7 = vld [vmem:[#allocation5] sm:$0xff]  ;;  %v60_v8 = vld [vmem:[#allocation2] sm:$0xff]  ;;  %s246_s12 = sshll.u32 %s428_s11, 4  ;;  %s247_s12 = int_to_ptr.vmem [resolvable:$true] %s246_s12 }
  0x28   :  { %282 = vmatpush3.msra.mxu0 %v64_v1  ;;  %293 = vmatpush3.msra.mxu1 %v161_v3  ;;  %v158_v9 = vld [vmem:[#allocation7 + $0x60] sm:$0xff]  ;;  %v157_v10 = vld [vmem:[#allocation7 + $0x58] sm:$0xff]  ;;  %v156_v11 = vld [vmem:[#allocation7 + $0x50] sm:$0xff]  ;;  %s395_s13 = scalar_lea.vmem %s247_s12, 128  ;;  %p400_p2 = scmp.lt.s32.totalorder %s247_s12, %s247_s12 }
  0x29   :  { %283 = vmatprep.subr.mxu0 %v426_v0  ;;  %294 = vmatprep.subr.mxu1 %v426_v0  ;;  %v155_v12 = vld [vmem:[#allocation7 + $0x48] sm:$0xff]  ;;  %v154_v13 = vld [vmem:[#allocation7 + $0x40] sm:$0xff]  ;;  %v153_v14 = vld [vmem:[#allocation7 + $0x38] sm:$0xff]  ;;  %p396_p1 = scmp.ne.s32.totalorder %s247_s12, %s395_s13  ;;  %p401_p3 = scmp.lt.s32.totalorder %s395_s13, %s395_s13 }
  0x2a   :  { %284 = vmatpush3.msra.mxu0 %v63_v2  ;;  %295 = vmatpush3.msra.mxu1 %v160_v5  ;;  %v152_v15 = vld [vmem:[#allocation7 + $0x30] sm:$0xff]  ;;  %v151_v16 = vld [vmem:[#allocation7 + $0x28] sm:$0xff]  ;;  %v150_v17 = vld [vmem:[#allocation7 + $0x20] sm:$0xff] }
  0x2b   :  { %285 = vmatprep.subr.mxu0 %v426_v0  ;;  %296 = vmatprep.subr.mxu1 %v426_v0  ;;  %v149_v18 = vld [vmem:[#allocation7 + $0x18] sm:$0xff]  ;;  %v148_v19 = vld [vmem:[#allocation7 + $0x10] sm:$0xff]  ;;  %v147_v20 = vld [vmem:[#allocation7 + $0x8] sm:$0xff]  ;;  %p402_p4 = por %p401_p3, %p400_p2 }
  0x2c   :  { %286 = vmatpush3.msra.mxu0 %v62_v4  ;;  %297 = vmatpush3.msra.mxu1 %v159_v6  ;;  %v146_v21 = vld [vmem:[#allocation7] sm:$0xff]  ;;  %v256_v22 = vld [vmem:[%s501_s2] ss:$0 sm:$0xff] }
  0x2d   :  { %287 = vmatprep.subr.mxu0 %v426_v0  ;;  %298 = vmatprep.subr.mxu1 %v426_v0  ;;  %v258_v26 = vld [vmem:[%s503_s4] ss:$0 sm:$0xff]  ;;  %p403_p5 = pnand %p402_p4, %p396_p1 }
  0x2e   :  { %288 = vmatpush3.msra.mxu0 %v61_v7  ;;  %299 = vmatpush3.msra.mxu1 %v158_v9 }
  0x2f   :  { %290 = vmatmul.mubr.msk.f32.vlgmr.msra.gmra.mxu0 %vm72_vm1, %v60_v8  ;;  %300 = vmatprep.subr.mxu1 %v426_v0 }
  0x30   :  { %301 = vmatpush3.msra.mxu1 %v157_v10 }
  0x31   :  { %302 = vmatprep.subr.mxu1 %v426_v0 }
  0x32   :  { %303 = vmatpush3.msra.mxu1 %v156_v11 }
  0x33   :  { %304 = vmatprep.subr.mxu1 %v426_v0 }
  0x34   :  { %305 = vmatpush3.msra.mxu1 %v155_v12 }
  0x35   :  { %306 = vmatprep.subr.mxu1 %v426_v0 }
  0x36   :  { %307 = vmatpush3.msra.mxu1 %v154_v13 }
  0x37   :  { %308 = vmatprep.subr.mxu1 %v426_v0 }
  0x38   :  { %309 = vmatpush3.msra.mxu1 %v153_v14 }
  0x39   :  { %310 = vmatprep.subr.mxu1 %v426_v0 }
  0x3a   :  { %311 = vmatpush3.msra.mxu1 %v152_v15 }
  0x3b   :  { %312 = vmatprep.subr.mxu1 %v426_v0 }
  0x3c   :  { %313 = vmatpush3.msra.mxu1 %v151_v16 }
  0x3d   :  { %314 = vmatprep.subr.mxu1 %v426_v0 }
  0x3e   :  { %315 = vmatpush3.msra.mxu1 %v150_v17 }
  0x3f   :  { %316 = vmatprep.subr.mxu1 %v426_v0 }
  0x40   :  { %317 = vmatpush3.msra.mxu1 %v149_v18 }
  0x41   :  { %318 = vmatprep.subr.mxu1 %v426_v0 }
  0x42   :  { %319 = vmatpush3.msra.mxu1 %v148_v19 }
  0x43   :  { %320 = vmatprep.subr.mxu1 %v426_v0 }
  0x44   :  { %321 = vmatpush3.msra.mxu1 %v147_v20 }
  0x45   :  { %322 = vmatprep.subr.mxu1 %v426_v0 }
  0x46   :  { %323 = vmatpush3.msra.mxu1 %v146_v21 }
  0xef   :  { %v142_v23 = vpop.f32.mrf.mxu0 }
  0xf0   :  { %v143_v24 = vadd.f32 %v256_v22, %v142_v23 }
  0xf1   :  { %v291_v25 = vpop.f32.mrf.mxu0 }
  0xf2   :  { %325 = vmatmul.mubr.f32.vlgmr.msra.gmra.mxu1 %v143_v24 }
 0x1b2   :  { %v235_v27 = vpop.f32.mrf.mxu1 }
 0x1b3   :  { %v236_v28 = vadd.f32 %v258_v26, %v235_v27 }
 0x1b4   :  { %v326_v29 = vpop.f32.mrf.mxu1 }
 0x1b5   :  { %239 = vst [vmem:[#allocation8] sm:$0xff] %v236_v28 }
 0x1b6   :  { %406 = shalt.err (!%p403_p5)
}
 0x1b7   :  { %249 = dma.vmem_to_hbm [thread:$0]  %s247_s12, 128, %s504_s5, [#allocation4]  }
 0x1b8   :  { %419 = dma.done.wait [#allocation4], 128  }
 0x1b9   :  { %420 = vsyncadd [#allocation4], 4294967168 }
 0x1ba   :  { %253 = vsyncpa [#allocation3], 1 }
 0x1bb   :  { %254 = vsyncpa [#allocation6], 1 }
 0x1bc   :  { %255 = vsyncpa [#allocation4], 1 }

</bundles_post_ra>
